<compile_context>
chip_gen: v5e
topology: v5e:2x2
jax: 0.10.0
libtpu: 0.0.40
codegen_flags: <defaults>
</compile_context>

<pallas_src>
import jax
import jax.numpy as jnp
from jax.experimental import pallas as pl
from jax.experimental.pallas import tpu as pltpu


# ----------------------------- Pallas kernel --------------------------------
def _cast_out(v, dtype):
    if jnp.issubdtype(dtype, jnp.integer):
        info = jnp.iinfo(dtype)
        v = jnp.clip(jnp.round(v), info.min, info.max)
    return v.astype(dtype)


def _resized_crop_kernel(x_ref, wx1T_ref, wx2T_ref, wy1_ref, wy2_ref,
                         o1_ref, o2_ref):
    B, H, W = x_ref.shape
    S = wx1T_ref.shape[1]
    cdt = wx1T_ref.dtype                       # bf16 compute dtype

    # Cast in-kernel (no wrapper-side HBM re-write of the input).
    img = x_ref[...].astype(cdt).reshape(B * H, W)

    # Column pass: one big MXU matmul per view over all B planes of the block
    # (bf16 x bf16 inputs, f32 accumulation).
    r1 = jnp.dot(img, wx1T_ref[...],
                 preferred_element_type=jnp.float32).astype(cdt)
    r2 = jnp.dot(img, wx2T_ref[...],
                 preferred_element_type=jnp.float32).astype(cdt)

    wy1 = wy1_ref[...]
    wy2 = wy2_ref[...]

    # Row pass: plain 2-D dots per plane against the resident (S, H) weights.
    # Statically unrolled (B is capped in _pick_batch); no broadcast of the
    # row weights is ever materialised.
    for b in range(B):
        rows = slice(b * H, (b + 1) * H)
        v1 = jnp.dot(wy1, r1[rows, :], preferred_element_type=jnp.float32)
        v2 = jnp.dot(wy2, r2[rows, :], preferred_element_type=jnp.float32)
        o1_ref[b, :, :] = _cast_out(v1, o1_ref.dtype)
        o2_ref[b, :, :] = _cast_out(v2, o2_ref.dtype)


# ----------------------- VMEM / batch-size selection ------------------------
def _vmem_budget_bytes():
    """Generation-aware VMEM budget (v5e/v6e: 128 MiB physical, v7x: 64 MiB)."""
    cap = 64 * 1024 * 1024                     # conservative default (v7x)
    try:
        cap = int(pltpu.get_tpu_info().vmem_capacity_bytes)
    except Exception:
        pass
    budget = int(cap * 0.55)                   # planning budget for _pick_batch
    limit = int(cap * 0.75)                    # scoped vmem limit for Mosaic
    return budget, limit


def _num_tensorcores():
    try:
        kind = (getattr(jax.devices()[0], "device_kind", "") or "").lower()
        if "v7" in kind:
            return 2
    except Exception:
        pass
    return 1


def _pick_batch(NC, H, W, S, in_itemsize, out_itemsize, w_itemsize,
                budget_bytes, num_cores, unroll_cap=32):
    """Planes per grid step: as large as the VMEM budget allows (big blocks
    amortise the ~0.35us/step pipeline overhead and fill the MXU M = B*H dim),
    capped by the static row-pass unroll, with >= 2 grid steps per TensorCore
    on multi-core chips.  NC divisibility is NOT required (cdiv grid)."""
    # double-buffered input block + two double-buffered output blocks
    per_plane = 2 * H * W * in_itemsize + 2 * 2 * S * S * out_itemsize
    # in-kernel live intermediates: bf16 image copy + f32/bf16 column results
    per_plane += H * W * w_itemsize + 2 * H * S * (4 + w_itemsize)
    # resident weights (conservatively counted as double-buffered)
    fixed = 2 * w_itemsize * 2 * S * (W + H)
    b_vmem = max(1, (budget_bytes - fixed) // per_plane)
    B = int(min(NC, unroll_cap, b_vmem))
    if num_cores > 1 and NC >= 2 * num_cores:
        B = min(B, max(1, NC // (2 * num_cores)))
    return max(1, B)


def _pallas_resized_crop(x_nc_hw, wx1T, wx2T, wy1, wy2, size):
    NC, H, W = x_nc_hw.shape
    S = size
    out_dtype = x_nc_hw.dtype
    in_bytes = jnp.dtype(x_nc_hw.dtype).itemsize
    out_bytes = jnp.dtype(out_dtype).itemsize
    w_bytes = jnp.dtype(wx1T.dtype).itemsize

    budget, vmem_limit = _vmem_budget_bytes()
    B = _pick_batch(NC, H, W, S, in_bytes, out_bytes, w_bytes,
                    budget, _num_tensorcores())
    num_steps = pl.cdiv(NC, B)   # partial last block handled by Pallas masking

    flops = 2 * 2 * NC * H * S * (W + S)       # 2 views x (column + row pass)
    bytes_accessed = (NC * H * W * in_bytes
                      + 2 * NC * S * S * out_bytes
                      + 2 * w_bytes * 2 * S * (W + H))

    out_sds = jax.ShapeDtypeStruct((NC, S, S), out_dtype)
    o_spec = pl.BlockSpec((B, S, S), lambda i: (i, 0, 0))

    return pl.pallas_call(
        _resized_crop_kernel,
        out_shape=(out_sds, out_sds),
        grid_spec=pltpu.PrefetchScalarGridSpec(
            num_scalar_prefetch=0,
            grid=(num_steps,),
            in_specs=[
                pl.BlockSpec((B, H, W), lambda i: (i, 0, 0)),
                pl.BlockSpec((W, S), lambda i: (0, 0)),   # pre-transposed col weights
                pl.BlockSpec((W, S), lambda i: (0, 0)),
                pl.BlockSpec((S, H), lambda i: (0, 0)),   # row weights (resident)
                pl.BlockSpec((S, H), lambda i: (0, 0)),
            ],
            out_specs=[o_spec, o_spec],
        ),
        compiler_params=pltpu.CompilerParams(
            dimension_semantics=("parallel",),
            vmem_limit_bytes=vmem_limit),
        cost_estimate=pl.CostEstimate(flops=int(flops), transcendentals=0,
                                      bytes_accessed=int(bytes_accessed)),
    )(x_nc_hw, wx1T, wx2T, wy1, wy2)


# ------------------------ RandomResizedCrop params (glue) -------------------
def _sample_crop(key, H, W, scale=(0.08, 1.0), ratio=(3.0 / 4.0, 4.0 / 3.0)):
    """Simplified torchvision RandomResizedCrop.get_params (single attempt,
    clamped to the image instead of the 10-try / center-crop fallback)."""
    # TODO(synk): torchvision uses up to 10 rejection-sampling attempts + center-crop fallback.
    k1, k2, k3, k4 = jax.random.split(key, 4)
    area = float(H * W)
    target_area = area * jax.random.uniform(
        k1, (), jnp.float32, minval=scale[0], maxval=scale[1])
    log_ratio = jax.random.uniform(
        k2, (), jnp.float32,
        minval=jnp.log(jnp.float32(ratio[0])),
        maxval=jnp.log(jnp.float32(ratio[1])))
    ar = jnp.exp(log_ratio)
    w = jnp.clip(jnp.round(jnp.sqrt(target_area * ar)), 1, W).astype(jnp.int32)
    h = jnp.clip(jnp.round(jnp.sqrt(target_area / ar)), 1, H).astype(jnp.int32)
    i = jnp.floor(jax.random.uniform(k3, (), jnp.float32)
                  * (H - h + 1).astype(jnp.float32)).astype(jnp.int32)
    j = jnp.floor(jax.random.uniform(k4, (), jnp.float32)
                  * (W - w + 1).astype(jnp.float32)).astype(jnp.int32)
    return i, j, h, w


def _interp_matrix(out_size, in_size, start, length):
    """Bilinear (align_corners=False, no antialias) interpolation matrix
    mapping the crop window [start, start+length) of an axis of size `in_size`
    onto `out_size` output samples. Shape (out_size, in_size)."""
    # TODO(synk): torchvision v2 defaults to antialias=True for bilinear downscale.
    start_f = start.astype(jnp.float32)
    length_f = length.astype(jnp.float32)
    o = jnp.arange(out_size, dtype=jnp.float32)
    src = (o + 0.5) * (length_f / out_size) - 0.5 + start_f
    i0f = jnp.floor(src)
    frac = src - i0f
    lo = start
    hi = start + length - 1
    i0 = jnp.clip(i0f.astype(jnp.int32), lo, hi)
    i1 = jnp.clip(i0 + 1, lo, hi)
    w0 = (1.0 - frac)[:, None]
    w1 = frac[:, None]
    m = (jax.nn.one_hot(i0, in_size, dtype=jnp.float32) * w0
         + jax.nn.one_hot(i1, in_size, dtype=jnp.float32) * w1)
    return m


def _build_view_weights(key, H, W, size):
    i, j, h, w = _sample_crop(key, H, W)
    wy = _interp_matrix(size, H, i, h)   # (size, H)
    wx = _interp_matrix(size, W, j, w)   # (size, W)
    return wy, wx


# ------------------------------ Module wrapper -------------------------------
def data_augmentation(x, key, size, compute_dtype=jnp.bfloat16):
    """Equivalent of DataAugmentation.forward: returns two independently
    RandomResizedCrop'd views of x (NCHW -> NCHW with spatial = size).
    Crop parameters are shared across the batch per view (torchvision applied
    to a batched tensor); per-sample crops would need per-plane weight stacks."""
    # TODO(synk): per-sample crop parameters (typical DataLoader usage) are not implemented.
    N, C, H, W = x.shape
    S = int(size)
    k1, k2 = jax.random.split(key)
    wy1, wx1 = _build_view_weights(k1, H, W, S)
    wy2, wx2 = _build_view_weights(k2, H, W, S)
    # MXU-friendly compute dtype: bf16 weights (f32 accumulation in-kernel).
    wx1T = wx1.T.astype(compute_dtype)      # (W, S), pre-transposed column weights
    wx2T = wx2.T.astype(compute_dtype)
    wy1 = wy1.astype(compute_dtype)         # (S, H) row weights
    wy2 = wy2.astype(compute_dtype)
    xr = x.reshape(N * C, H, W)             # native dtype in HBM; cast in-kernel
    o1, o2 = _pallas_resized_crop(xr, wx1T, wx2T, wy1, wy2, S)
    return o1.reshape(N, C, S, S), o2.reshape(N, C, S, S)


if __name__ == "__main__":
    key = jax.random.PRNGKey(0)
    kx, kaug = jax.random.split(key)
    N, C, H, W = 2, 4, 16, 16
    size = 8
    x = jax.random.normal(kx, (N, C, H, W), dtype=jnp.float32)

    view1, view2 = data_augmentation(x, kaug, size)
    jax.block_until_ready((view1, view2))

    assert view1.shape == (N, C, size, size)
    assert view2.shape == (N, C, size, size)
    assert jnp.isfinite(view1).all() and jnp.isfinite(view2).all()
    print("KERNEL_OK")
</pallas_src>

<mosaic_0001>
module attributes {stable_mosaic.version = 11 : i64} {
  func.func @_resized_crop_kernel(%arg0: i32, %arg1: memref<8x16x16xf32, #tpu.memory_space<vmem>>, %arg2: memref<16x8xbf16, #tpu.memory_space<vmem>>, %arg3: memref<16x8xbf16, #tpu.memory_space<vmem>>, %arg4: memref<8x16xbf16, #tpu.memory_space<vmem>>, %arg5: memref<8x16xbf16, #tpu.memory_space<vmem>>, %arg6: memref<8x8x8xf32, #tpu.memory_space<vmem>>, %arg7: memref<8x8x8xf32, #tpu.memory_space<vmem>>) attributes {dimension_semantics = [#tpu.dimension_semantics<parallel>], iteration_bounds = array<i64: 1>, scalar_prefetch = 0 : i64, scratch_operands = 0 : i64, tpu.core_type = #tpu.core_type<tc>, window_params = [{transform_indices = @transform_0, window_bounds = array<i64: 8, 16, 16>}, {pipeline_mode = #tpu.pipeline_mode<synchronous>, transform_indices = @transform_1, window_bounds = array<i64: 16, 8>}, {pipeline_mode = #tpu.pipeline_mode<synchronous>, transform_indices = @transform_2, window_bounds = array<i64: 16, 8>}, {pipeline_mode = #tpu.pipeline_mode<synchronous>, transform_indices = @transform_3, window_bounds = array<i64: 8, 16>}, {pipeline_mode = #tpu.pipeline_mode<synchronous>, transform_indices = @transform_4, window_bounds = array<i64: 8, 16>}, {transform_indices = @transform_5, window_bounds = array<i64: 8, 8, 8>}, {transform_indices = @transform_6, window_bounds = array<i64: 8, 8, 8>}]} {
    %c0 = arith.constant 0 : index
    %c0_0 = arith.constant 0 : index
    %c0_1 = arith.constant 0 : index
    %0 = vector.load %arg1[%c0, %c0_0, %c0_1] : memref<8x16x16xf32, #tpu.memory_space<vmem>>, vector<8x16x16xf32>
    %1 = arith.truncf %0 : vector<8x16x16xf32> to vector<8x16x16xbf16>
    %2 = vector.shape_cast %1 : vector<8x16x16xbf16> to vector<128x16xbf16>
    %c0_2 = arith.constant 0 : index
    %c0_3 = arith.constant 0 : index
    %3 = vector.load %arg2[%c0_2, %c0_3] : memref<16x8xbf16, #tpu.memory_space<vmem>>, vector<16x8xbf16>
    %cst = arith.constant dense<0.000000e+00> : vector<128x8xf32>
    %4 = tpu.matmul %2, %3, %cst {dimension_numbers = #tpu.dot_dimension_numbers<[1], [0], [0], [1], [0, 0, 1, 1], [], []>} : vector<128x16xbf16>, vector<16x8xbf16>, vector<128x8xf32> -> vector<128x8xf32>
    %5 = arith.truncf %4 : vector<128x8xf32> to vector<128x8xbf16>
    %c0_4 = arith.constant 0 : index
    %c0_5 = arith.constant 0 : index
    %6 = vector.load %arg3[%c0_4, %c0_5] : memref<16x8xbf16, #tpu.memory_space<vmem>>, vector<16x8xbf16>
    %cst_6 = arith.constant dense<0.000000e+00> : vector<128x8xf32>
    %7 = tpu.matmul %2, %6, %cst_6 {dimension_numbers = #tpu.dot_dimension_numbers<[1], [0], [0], [1], [0, 0, 1, 1], [], []>} : vector<128x16xbf16>, vector<16x8xbf16>, vector<128x8xf32> -> vector<128x8xf32>
    %8 = arith.truncf %7 : vector<128x8xf32> to vector<128x8xbf16>
    %c0_7 = arith.constant 0 : index
    %c0_8 = arith.constant 0 : index
    %9 = vector.load %arg4[%c0_7, %c0_8] : memref<8x16xbf16, #tpu.memory_space<vmem>>, vector<8x16xbf16>
    %c0_9 = arith.constant 0 : index
    %c0_10 = arith.constant 0 : index
    %10 = vector.load %arg5[%c0_9, %c0_10] : memref<8x16xbf16, #tpu.memory_space<vmem>>, vector<8x16xbf16>
    %11 = vector.extract_strided_slice %5 {offsets = [0, 0], sizes = [16, 8], strides = [1, 1]} : vector<128x8xbf16> to vector<16x8xbf16>
    %cst_11 = arith.constant dense<0.000000e+00> : vector<8x8xf32>
    %12 = tpu.matmul %9, %11, %cst_11 {dimension_numbers = #tpu.dot_dimension_numbers<[1], [0], [0], [1], [0, 0, 1, 1], [], []>} : vector<8x16xbf16>, vector<16x8xbf16>, vector<8x8xf32> -> vector<8x8xf32>
    %13 = vector.extract_strided_slice %8 {offsets = [0, 0], sizes = [16, 8], strides = [1, 1]} : vector<128x8xbf16> to vector<16x8xbf16>
    %cst_12 = arith.constant dense<0.000000e+00> : vector<8x8xf32>
    %14 = tpu.matmul %10, %13, %cst_12 {dimension_numbers = #tpu.dot_dimension_numbers<[1], [0], [0], [1], [0, 0, 1, 1], [], []>} : vector<8x16xbf16>, vector<16x8xbf16>, vector<8x8xf32> -> vector<8x8xf32>
    %c0_13 = arith.constant 0 : index
    %c0_14 = arith.constant 0 : index
    %c0_15 = arith.constant 0 : index
    %15 = vector.load %arg6[%c0_13, %c0_14, %c0_15] : memref<8x8x8xf32, #tpu.memory_space<vmem>>, vector<1x8x8xf32>
    %16 = vector.shape_cast %15 : vector<1x8x8xf32> to vector<8x8xf32>
    %17 = vector.shape_cast %12 : vector<8x8xf32> to vector<1x8x8xf32>
    tpu.vector_store %arg6[%c0_13, %c0_14, %c0_15], %17 {strides = array<i32>} : memref<8x8x8xf32, #tpu.memory_space<vmem>>, vector<1x8x8xf32>,
    %c0_16 = arith.constant 0 : index
    %c0_17 = arith.constant 0 : index
    %c0_18 = arith.constant 0 : index
    %18 = vector.load %arg7[%c0_16, %c0_17, %c0_18] : memref<8x8x8xf32, #tpu.memory_space<vmem>>, vector<1x8x8xf32>
    %19 = vector.shape_cast %18 : vector<1x8x8xf32> to vector<8x8xf32>
    %20 = vector.shape_cast %14 : vector<8x8xf32> to vector<1x8x8xf32>
    tpu.vector_store %arg7[%c0_16, %c0_17, %c0_18], %20 {strides = array<i32>} : memref<8x8x8xf32, #tpu.memory_space<vmem>>, vector<1x8x8xf32>,
    %21 = vector.extract_strided_slice %5 {offsets = [16, 0], sizes = [16, 8], strides = [1, 1]} : vector<128x8xbf16> to vector<16x8xbf16>
    %cst_19 = arith.constant dense<0.000000e+00> : vector<8x8xf32>
    %22 = tpu.matmul %9, %21, %cst_19 {dimension_numbers = #tpu.dot_dimension_numbers<[1], [0], [0], [1], [0, 0, 1, 1], [], []>} : vector<8x16xbf16>, vector<16x8xbf16>, vector<8x8xf32> -> vector<8x8xf32>
    %23 = vector.extract_strided_slice %8 {offsets = [16, 0], sizes = [16, 8], strides = [1, 1]} : vector<128x8xbf16> to vector<16x8xbf16>
    %cst_20 = arith.constant dense<0.000000e+00> : vector<8x8xf32>
    %24 = tpu.matmul %10, %23, %cst_20 {dimension_numbers = #tpu.dot_dimension_numbers<[1], [0], [0], [1], [0, 0, 1, 1], [], []>} : vector<8x16xbf16>, vector<16x8xbf16>, vector<8x8xf32> -> vector<8x8xf32>
    %c1 = arith.constant 1 : index
    %c0_21 = arith.constant 0 : index
    %c0_22 = arith.constant 0 : index
    %25 = vector.load %arg6[%c1, %c0_21, %c0_22] : memref<8x8x8xf32, #tpu.memory_space<vmem>>, vector<1x8x8xf32>
    %26 = vector.shape_cast %25 : vector<1x8x8xf32> to vector<8x8xf32>
    %27 = vector.shape_cast %22 : vector<8x8xf32> to vector<1x8x8xf32>
    tpu.vector_store %arg6[%c1, %c0_21, %c0_22], %27 {strides = array<i32>} : memref<8x8x8xf32, #tpu.memory_space<vmem>>, vector<1x8x8xf32>,
    %c1_23 = arith.constant 1 : index
    %c0_24 = arith.constant 0 : index
    %c0_25 = arith.constant 0 : index
    %28 = vector.load %arg7[%c1_23, %c0_24, %c0_25] : memref<8x8x8xf32, #tpu.memory_space<vmem>>, vector<1x8x8xf32>
    %29 = vector.shape_cast %28 : vector<1x8x8xf32> to vector<8x8xf32>
    %30 = vector.shape_cast %24 : vector<8x8xf32> to vector<1x8x8xf32>
    tpu.vector_store %arg7[%c1_23, %c0_24, %c0_25], %30 {strides = array<i32>} : memref<8x8x8xf32, #tpu.memory_space<vmem>>, vector<1x8x8xf32>,
    %31 = vector.extract_strided_slice %5 {offsets = [32, 0], sizes = [16, 8], strides = [1, 1]} : vector<128x8xbf16> to vector<16x8xbf16>
    %cst_26 = arith.constant dense<0.000000e+00> : vector<8x8xf32>
    %32 = tpu.matmul %9, %31, %cst_26 {dimension_numbers = #tpu.dot_dimension_numbers<[1], [0], [0], [1], [0, 0, 1, 1], [], []>} : vector<8x16xbf16>, vector<16x8xbf16>, vector<8x8xf32> -> vector<8x8xf32>
    %33 = vector.extract_strided_slice %8 {offsets = [32, 0], sizes = [16, 8], strides = [1, 1]} : vector<128x8xbf16> to vector<16x8xbf16>
    %cst_27 = arith.constant dense<0.000000e+00> : vector<8x8xf32>
    %34 = tpu.matmul %10, %33, %cst_27 {dimension_numbers = #tpu.dot_dimension_numbers<[1], [0], [0], [1], [0, 0, 1, 1], [], []>} : vector<8x16xbf16>, vector<16x8xbf16>, vector<8x8xf32> -> vector<8x8xf32>
    %c2 = arith.constant 2 : index
    %c0_28 = arith.constant 0 : index
    %c0_29 = arith.constant 0 : index
    %35 = vector.load %arg6[%c2, %c0_28, %c0_29] : memref<8x8x8xf32, #tpu.memory_space<vmem>>, vector<1x8x8xf32>
    %36 = vector.shape_cast %35 : vector<1x8x8xf32> to vector<8x8xf32>
    %37 = vector.shape_cast %32 : vector<8x8xf32> to vector<1x8x8xf32>
    tpu.vector_store %arg6[%c2, %c0_28, %c0_29], %37 {strides = array<i32>} : memref<8x8x8xf32, #tpu.memory_space<vmem>>, vector<1x8x8xf32>,
    %c2_30 = arith.constant 2 : index
    %c0_31 = arith.constant 0 : index
    %c0_32 = arith.constant 0 : index
    %38 = vector.load %arg7[%c2_30, %c0_31, %c0_32] : memref<8x8x8xf32, #tpu.memory_space<vmem>>, vector<1x8x8xf32>
    %39 = vector.shape_cast %38 : vector<1x8x8xf32> to vector<8x8xf32>
    %40 = vector.shape_cast %34 : vector<8x8xf32> to vector<1x8x8xf32>
    tpu.vector_store %arg7[%c2_30, %c0_31, %c0_32], %40 {strides = array<i32>} : memref<8x8x8xf32, #tpu.memory_space<vmem>>, vector<1x8x8xf32>,
    %41 = vector.extract_strided_slice %5 {offsets = [48, 0], sizes = [16, 8], strides = [1, 1]} : vector<128x8xbf16> to vector<16x8xbf16>
    %cst_33 = arith.constant dense<0.000000e+00> : vector<8x8xf32>
    %42 = tpu.matmul %9, %41, %cst_33 {dimension_numbers = #tpu.dot_dimension_numbers<[1], [0], [0], [1], [0, 0, 1, 1], [], []>} : vector<8x16xbf16>, vector<16x8xbf16>, vector<8x8xf32> -> vector<8x8xf32>
    %43 = vector.extract_strided_slice %8 {offsets = [48, 0], sizes = [16, 8], strides = [1, 1]} : vector<128x8xbf16> to vector<16x8xbf16>
    %cst_34 = arith.constant dense<0.000000e+00> : vector<8x8xf32>
    %44 = tpu.matmul %10, %43, %cst_34 {dimension_numbers = #tpu.dot_dimension_numbers<[1], [0], [0], [1], [0, 0, 1, 1], [], []>} : vector<8x16xbf16>, vector<16x8xbf16>, vector<8x8xf32> -> vector<8x8xf32>
    %c3 = arith.constant 3 : index
    %c0_35 = arith.constant 0 : index
    %c0_36 = arith.constant 0 : index
    %45 = vector.load %arg6[%c3, %c0_35, %c0_36] : memref<8x8x8xf32, #tpu.memory_space<vmem>>, vector<1x8x8xf32>
    %46 = vector.shape_cast %45 : vector<1x8x8xf32> to vector<8x8xf32>
    %47 = vector.shape_cast %42 : vector<8x8xf32> to vector<1x8x8xf32>
    tpu.vector_store %arg6[%c3, %c0_35, %c0_36], %47 {strides = array<i32>} : memref<8x8x8xf32, #tpu.memory_space<vmem>>, vector<1x8x8xf32>,
    %c3_37 = arith.constant 3 : index
    %c0_38 = arith.constant 0 : index
    %c0_39 = arith.constant 0 : index
    %48 = vector.load %arg7[%c3_37, %c0_38, %c0_39] : memref<8x8x8xf32, #tpu.memory_space<vmem>>, vector<1x8x8xf32>
    %49 = vector.shape_cast %48 : vector<1x8x8xf32> to vector<8x8xf32>
    %50 = vector.shape_cast %44 : vector<8x8xf32> to vector<1x8x8xf32>
    tpu.vector_store %arg7[%c3_37, %c0_38, %c0_39], %50 {strides = array<i32>} : memref<8x8x8xf32, #tpu.memory_space<vmem>>, vector<1x8x8xf32>,
    %51 = vector.extract_strided_slice %5 {offsets = [64, 0], sizes = [16, 8], strides = [1, 1]} : vector<128x8xbf16> to vector<16x8xbf16>
    %cst_40 = arith.constant dense<0.000000e+00> : vector<8x8xf32>
    %52 = tpu.matmul %9, %51, %cst_40 {dimension_numbers = #tpu.dot_dimension_numbers<[1], [0], [0], [1], [0, 0, 1, 1], [], []>} : vector<8x16xbf16>, vector<16x8xbf16>, vector<8x8xf32> -> vector<8x8xf32>
    %53 = vector.extract_strided_slice %8 {offsets = [64, 0], sizes = [16, 8], strides = [1, 1]} : vector<128x8xbf16> to vector<16x8xbf16>
    %cst_41 = arith.constant dense<0.000000e+00> : vector<8x8xf32>
    %54 = tpu.matmul %10, %53, %cst_41 {dimension_numbers = #tpu.dot_dimension_numbers<[1], [0], [0], [1], [0, 0, 1, 1], [], []>} : vector<8x16xbf16>, vector<16x8xbf16>, vector<8x8xf32> -> vector<8x8xf32>
    %c4 = arith.constant 4 : index
    %c0_42 = arith.constant 0 : index
    %c0_43 = arith.constant 0 : index
    %55 = vector.load %arg6[%c4, %c0_42, %c0_43] : memref<8x8x8xf32, #tpu.memory_space<vmem>>, vector<1x8x8xf32>
    %56 = vector.shape_cast %55 : vector<1x8x8xf32> to vector<8x8xf32>
    %57 = vector.shape_cast %52 : vector<8x8xf32> to vector<1x8x8xf32>
    tpu.vector_store %arg6[%c4, %c0_42, %c0_43], %57 {strides = array<i32>} : memref<8x8x8xf32, #tpu.memory_space<vmem>>, vector<1x8x8xf32>,
    %c4_44 = arith.constant 4 : index
    %c0_45 = arith.constant 0 : index
    %c0_46 = arith.constant 0 : index
    %58 = vector.load %arg7[%c4_44, %c0_45, %c0_46] : memref<8x8x8xf32, #tpu.memory_space<vmem>>, vector<1x8x8xf32>
    %59 = vector.shape_cast %58 : vector<1x8x8xf32> to vector<8x8xf32>
    %60 = vector.shape_cast %54 : vector<8x8xf32> to vector<1x8x8xf32>
    tpu.vector_store %arg7[%c4_44, %c0_45, %c0_46], %60 {strides = array<i32>} : memref<8x8x8xf32, #tpu.memory_space<vmem>>, vector<1x8x8xf32>,
    %61 = vector.extract_strided_slice %5 {offsets = [80, 0], sizes = [16, 8], strides = [1, 1]} : vector<128x8xbf16> to vector<16x8xbf16>
    %cst_47 = arith.constant dense<0.000000e+00> : vector<8x8xf32>
    %62 = tpu.matmul %9, %61, %cst_47 {dimension_numbers = #tpu.dot_dimension_numbers<[1], [0], [0], [1], [0, 0, 1, 1], [], []>} : vector<8x16xbf16>, vector<16x8xbf16>, vector<8x8xf32> -> vector<8x8xf32>
    %63 = vector.extract_strided_slice %8 {offsets = [80, 0], sizes = [16, 8], strides = [1, 1]} : vector<128x8xbf16> to vector<16x8xbf16>
    %cst_48 = arith.constant dense<0.000000e+00> : vector<8x8xf32>
    %64 = tpu.matmul %10, %63, %cst_48 {dimension_numbers = #tpu.dot_dimension_numbers<[1], [0], [0], [1], [0, 0, 1, 1], [], []>} : vector<8x16xbf16>, vector<16x8xbf16>, vector<8x8xf32> -> vector<8x8xf32>
    %c5 = arith.constant 5 : index
    %c0_49 = arith.constant 0 : index
    %c0_50 = arith.constant 0 : index
    %65 = vector.load %arg6[%c5, %c0_49, %c0_50] : memref<8x8x8xf32, #tpu.memory_space<vmem>>, vector<1x8x8xf32>
    %66 = vector.shape_cast %65 : vector<1x8x8xf32> to vector<8x8xf32>
    %67 = vector.shape_cast %62 : vector<8x8xf32> to vector<1x8x8xf32>
    tpu.vector_store %arg6[%c5, %c0_49, %c0_50], %67 {strides = array<i32>} : memref<8x8x8xf32, #tpu.memory_space<vmem>>, vector<1x8x8xf32>,
    %c5_51 = arith.constant 5 : index
    %c0_52 = arith.constant 0 : index
    %c0_53 = arith.constant 0 : index
    %68 = vector.load %arg7[%c5_51, %c0_52, %c0_53] : memref<8x8x8xf32, #tpu.memory_space<vmem>>, vector<1x8x8xf32>
    %69 = vector.shape_cast %68 : vector<1x8x8xf32> to vector<8x8xf32>
    %70 = vector.shape_cast %64 : vector<8x8xf32> to vector<1x8x8xf32>
    tpu.vector_store %arg7[%c5_51, %c0_52, %c0_53], %70 {strides = array<i32>} : memref<8x8x8xf32, #tpu.memory_space<vmem>>, vector<1x8x8xf32>,
    %71 = vector.extract_strided_slice %5 {offsets = [96, 0], sizes = [16, 8], strides = [1, 1]} : vector<128x8xbf16> to vector<16x8xbf16>
    %cst_54 = arith.constant dense<0.000000e+00> : vector<8x8xf32>
    %72 = tpu.matmul %9, %71, %cst_54 {dimension_numbers = #tpu.dot_dimension_numbers<[1], [0], [0], [1], [0, 0, 1, 1], [], []>} : vector<8x16xbf16>, vector<16x8xbf16>, vector<8x8xf32> -> vector<8x8xf32>
    %73 = vector.extract_strided_slice %8 {offsets = [96, 0], sizes = [16, 8], strides = [1, 1]} : vector<128x8xbf16> to vector<16x8xbf16>
    %cst_55 = arith.constant dense<0.000000e+00> : vector<8x8xf32>
    %74 = tpu.matmul %10, %73, %cst_55 {dimension_numbers = #tpu.dot_dimension_numbers<[1], [0], [0], [1], [0, 0, 1, 1], [], []>} : vector<8x16xbf16>, vector<16x8xbf16>, vector<8x8xf32> -> vector<8x8xf32>
    %c6 = arith.constant 6 : index
    %c0_56 = arith.constant 0 : index
    %c0_57 = arith.constant 0 : index
    %75 = vector.load %arg6[%c6, %c0_56, %c0_57] : memref<8x8x8xf32, #tpu.memory_space<vmem>>, vector<1x8x8xf32>
    %76 = vector.shape_cast %75 : vector<1x8x8xf32> to vector<8x8xf32>
    %77 = vector.shape_cast %72 : vector<8x8xf32> to vector<1x8x8xf32>
    tpu.vector_store %arg6[%c6, %c0_56, %c0_57], %77 {strides = array<i32>} : memref<8x8x8xf32, #tpu.memory_space<vmem>>, vector<1x8x8xf32>,
    %c6_58 = arith.constant 6 : index
    %c0_59 = arith.constant 0 : index
    %c0_60 = arith.constant 0 : index
    %78 = vector.load %arg7[%c6_58, %c0_59, %c0_60] : memref<8x8x8xf32, #tpu.memory_space<vmem>>, vector<1x8x8xf32>
    %79 = vector.shape_cast %78 : vector<1x8x8xf32> to vector<8x8xf32>
    %80 = vector.shape_cast %74 : vector<8x8xf32> to vector<1x8x8xf32>
    tpu.vector_store %arg7[%c6_58, %c0_59, %c0_60], %80 {strides = array<i32>} : memref<8x8x8xf32, #tpu.memory_space<vmem>>, vector<1x8x8xf32>,
    %81 = vector.extract_strided_slice %5 {offsets = [112, 0], sizes = [16, 8], strides = [1, 1]} : vector<128x8xbf16> to vector<16x8xbf16>
    %cst_61 = arith.constant dense<0.000000e+00> : vector<8x8xf32>
    %82 = tpu.matmul %9, %81, %cst_61 {dimension_numbers = #tpu.dot_dimension_numbers<[1], [0], [0], [1], [0, 0, 1, 1], [], []>} : vector<8x16xbf16>, vector<16x8xbf16>, vector<8x8xf32> -> vector<8x8xf32>
    %83 = vector.extract_strided_slice %8 {offsets = [112, 0], sizes = [16, 8], strides = [1, 1]} : vector<128x8xbf16> to vector<16x8xbf16>
    %cst_62 = arith.constant dense<0.000000e+00> : vector<8x8xf32>
    %84 = tpu.matmul %10, %83, %cst_62 {dimension_numbers = #tpu.dot_dimension_numbers<[1], [0], [0], [1], [0, 0, 1, 1], [], []>} : vector<8x16xbf16>, vector<16x8xbf16>, vector<8x8xf32> -> vector<8x8xf32>
    %c7 = arith.constant 7 : index
    %c0_63 = arith.constant 0 : index
    %c0_64 = arith.constant 0 : index
    %85 = vector.load %arg6[%c7, %c0_63, %c0_64] : memref<8x8x8xf32, #tpu.memory_space<vmem>>, vector<1x8x8xf32>
    %86 = vector.shape_cast %85 : vector<1x8x8xf32> to vector<8x8xf32>
    %87 = vector.shape_cast %82 : vector<8x8xf32> to vector<1x8x8xf32>
    tpu.vector_store %arg6[%c7, %c0_63, %c0_64], %87 {strides = array<i32>} : memref<8x8x8xf32, #tpu.memory_space<vmem>>, vector<1x8x8xf32>,
    %c7_65 = arith.constant 7 : index
    %c0_66 = arith.constant 0 : index
    %c0_67 = arith.constant 0 : index
    %88 = vector.load %arg7[%c7_65, %c0_66, %c0_67] : memref<8x8x8xf32, #tpu.memory_space<vmem>>, vector<1x8x8xf32>
    %89 = vector.shape_cast %88 : vector<1x8x8xf32> to vector<8x8xf32>
    %90 = vector.shape_cast %84 : vector<8x8xf32> to vector<1x8x8xf32>
    tpu.vector_store %arg7[%c7_65, %c0_66, %c0_67], %90 {strides = array<i32>} : memref<8x8x8xf32, #tpu.memory_space<vmem>>, vector<1x8x8xf32>,
    return
  }
  func.func @transform_0(%arg0: i32) -> (i32, i32, i32) {
    %c0_i32 = arith.constant 0 : i32
    %c0_i32_0 = arith.constant 0 : i32
    %c0_i32_1 = arith.constant 0 : i32
    return %arg0, %c0_i32, %c0_i32_0 : i32, i32, i32
  }
  func.func @transform_1(%arg0: i32) -> (i32, i32) {
    %c0_i32 = arith.constant 0 : i32
    %c0_i32_0 = arith.constant 0 : i32
    %c0_i32_1 = arith.constant 0 : i32
    return %c0_i32, %c0_i32_0 : i32, i32
  }
  func.func @transform_2(%arg0: i32) -> (i32, i32) {
    %c0_i32 = arith.constant 0 : i32
    %c0_i32_0 = arith.constant 0 : i32
    %c0_i32_1 = arith.constant 0 : i32
    return %c0_i32, %c0_i32_0 : i32, i32
  }
  func.func @transform_3(%arg0: i32) -> (i32, i32) {
    %c0_i32 = arith.constant 0 : i32
    %c0_i32_0 = arith.constant 0 : i32
    %c0_i32_1 = arith.constant 0 : i32
    return %c0_i32, %c0_i32_0 : i32, i32
  }
  func.func @transform_4(%arg0: i32) -> (i32, i32) {
    %c0_i32 = arith.constant 0 : i32
    %c0_i32_0 = arith.constant 0 : i32
    %c0_i32_1 = arith.constant 0 : i32
    return %c0_i32, %c0_i32_0 : i32, i32
  }
  func.func @transform_5(%arg0: i32) -> (i32, i32, i32) {
    %c0_i32 = arith.constant 0 : i32
    %c0_i32_0 = arith.constant 0 : i32
    %c0_i32_1 = arith.constant 0 : i32
    return %arg0, %c0_i32, %c0_i32_0 : i32, i32, i32
  }
  func.func @transform_6(%arg0: i32) -> (i32, i32, i32) {
    %c0_i32 = arith.constant 0 : i32
    %c0_i32_0 = arith.constant 0 : i32
    %c0_i32_1 = arith.constant 0 : i32
    return %arg0, %c0_i32, %c0_i32_0 : i32, i32, i32
  }
}

</mosaic_0001>

<bundles_post_ra>
// kernel: tpu_custom_call.1
= control target key start
LH: loop header
LB: loop body
LE: loop exit
PB: predicated region body
PF: predicated region fallthrough
CT: control target
= control target key end

     0   :  { %12 = vsyncpa [#allocation3], 0  ;;  %s927_s0 = inlined_call_operand.hbm [shape: f32[8,16,16], index: 0, kind: input, shape index: {}]   ;;  %s928_s1 = inlined_call_operand.vmem [shape: bf16[16,8], index: 1, kind: input, shape index: {}]   ;;  %s929_s2 = inlined_call_operand.vmem [shape: bf16[16,8], index: 2, kind: input, shape index: {}]   ;;  %s930_s3 = inlined_call_operand.vmem [shape: bf16[8,16], index: 3, kind: input, shape index: {}]   ;;  %s931_s4 = inlined_call_operand.vmem [shape: bf16[8,16], index: 4, kind: input, shape index: {}]   ;;  %s932_s5 = inlined_call_operand.hbm [shape: f32[8,8,8], index: 5, kind: output, shape index: {0}]   ;;  %s933_s6 = inlined_call_operand.hbm [shape: f32[8,8,8], index: 6, kind: output, shape index: {1}]  }
   0x1   :  { %13 = vsyncpa [#allocation4], 0 }
   0x2   :  { %14 = vsyncpa [#allocation7], 0  ;;  %s19_s23 = sshll.u32 %s927_s0, 4  ;;  %s789_s24 = smov [#allocation2]   ;;  %s20_s23 = int_to_ptr.hbm [resolvable:$true] %s19_s23 }
   0x3   :  { %s21_s25 = sshll.u32 %s789_s24, 4  ;;  %s790_s26 = smov 128   ;;  %s22_s25 = int_to_ptr.vmem [resolvable:$true] %s21_s25 }
   0x4   :  { %s791_s27 = smov 8  }
   0x5   :  { %27 = dma.hbm_to_vmem [thread:$0]  %s20_s23, 2048, %s22_s25, [#allocation3], %s790_s26, %s790_s26, %s791_s27  }
   0x6   :  { %783 = dma.done.wait [#allocation3], 2048  }
   0x7   :  { %784 = vsyncadd [#allocation3], 4294965248  ;;  %v704_v0 = vld [vmem:[%s928_s1] sm:$0xff]  ;;  %v42_v3 = vld [vmem:[#allocation2 + $0x8] sm:$0xff]  ;;  %vm121_vm0 = vcmask 130048   ;;  %vm330_vm1 = vcmask 64512  }
   0x8   :  { %v705_v1 = vld [vmem:[%s929_s2] sm:$0xff]  ;;  %153 = vmatpush.bf16.msra.mxu0 %v704_v0  ;;  %v58_v5 = vpack.c.bf16 %v42_v3, %v42_v3  ;;  %v43_v9 = vld [vmem:[#allocation2 + $0x10] sm:$0xff]  ;;  %v44_v10 = vld [vmem:[#allocation2 + $0x18] sm:$0xff]  ;;  %s633_s11 = sshll.u32 %s932_s5, 4  ;;  %s793_s12 = smov [#allocation6]   ;;  %s634_s11 = int_to_ptr.hbm [resolvable:$true] %s633_s11 }
   0x9   :  { %v41_v2 = vld [vmem:[#allocation2] sm:$0xff]  ;;  %226 = vmatpush.bf16.msra.mxu1 %v705_v1  ;;  %v59_v11 = vpack.c.bf16 %v43_v9, %v43_v9  ;;  %v60_v12 = vpack.c.bf16 %v44_v10, %v44_v10  ;;  %v46_v17 = vld [vmem:[#allocation2 + $0x28] sm:$0xff]  ;;  %v47_v23 = vld [vmem:[#allocation2 + $0x30] sm:$0xff]  ;;  %s644_s13 = sshll.u32 %s793_s12, 4  ;;  %s646_s16 = sshll.u32 %s933_s6, 4  ;;  %s645_s13 = int_to_ptr.vmem [resolvable:$true] %s644_s13  ;;  %s647_s16 = int_to_ptr.hbm [resolvable:$true] %s646_s16 }
   0xa   :  { %v57_v4 = vpack.c.bf16 %v41_v2, %v41_v2  ;;  %v92_v7 = vunpack.c.l.b16 %v58_v5  ;;  %v45_v16 = vld [vmem:[#allocation2 + $0x20] sm:$0xff]  ;;  %v62_v19 = vpack.c.bf16 %v46_v17, %v46_v17  ;;  %v48_v24 = vld [vmem:[#allocation2 + $0x38] sm:$0xff]  ;;  %v63_v25 = vpack.c.bf16 %v47_v23, %v47_v23  ;;  %v50_v31 = vld [vmem:[#allocation2 + $0x48] sm:$0xff] }
   0xb   :  { %v93_v13 = vunpack.c.l.b16 %v59_v11  ;;  %v94_v14 = vunpack.c.l.b16 %v60_v12  ;;  %v61_v18 = vpack.c.bf16 %v45_v16, %v45_v16  ;;  %v64_v26 = vpack.c.bf16 %v48_v24, %v48_v24  ;;  %v49_v30 = vld [vmem:[#allocation2 + $0x40] sm:$0xff]  ;;  %v51_v37 = vld [vmem:[#allocation2 + $0x50] sm:$0xff]  ;;  %v52_v38 = vld [vmem:[#allocation2 + $0x58] sm:$0xff] }
   0xc   :  { %v91_v6 = vunpack.c.l.b16 %v57_v4  ;;  %v96_v21 = vunpack.c.l.b16 %v62_v19  ;;  %v97_v27 = vunpack.c.l.b16 %v63_v25  ;;  %v65_v32 = vpack.c.bf16 %v49_v30, %v49_v30  ;;  %v53_v44 = vld [vmem:[#allocation2 + $0x60] sm:$0xff]  ;;  %v54_v45 = vld [vmem:[#allocation2 + $0x68] sm:$0xff]  ;;  %v55_v51 = vld [vmem:[#allocation2 + $0x70] sm:$0xff] }
   0xd   :  { %v108_v15 = vpack.c.b16 %v94_v14, %v93_v13  ;;  %v95_v20 = vunpack.c.l.b16 %v61_v18  ;;  %v98_v28 = vunpack.c.l.b16 %v64_v26  ;;  %v66_v33 = vpack.c.bf16 %v50_v31, %v50_v31  ;;  %v56_v52 = vld [vmem:[#allocation2 + $0x78] sm:$0xff]  ;;  %v865_v9 = vld [vmem:[%s931_s4] sm:$0xf] }
   0xe   :  { %v107_v8 = vpack.c.b16 %v92_v7, %v91_v6  ;;  %v99_v34 = vunpack.c.l.b16 %v65_v32  ;;  %v67_v39 = vpack.c.bf16 %v51_v37, %v51_v37  ;;  %v68_v40 = vpack.c.bf16 %v52_v38, %v52_v38 }
   0xf   :  { %v109_v22 = vpack.c.b16 %v96_v21, %v95_v20  ;;  %v110_v29 = vpack.c.b16 %v98_v28, %v97_v27  ;;  %v100_v35 = vunpack.c.l.b16 %v66_v33  ;;  %v69_v46 = vpack.c.bf16 %v53_v44, %v53_v44 }
  0x10   :  { %668 = vmatmul.msk.bf16.vlgmr.msra.gmra.mxu0 %vm121_vm0, %v107_v8  ;;  %680 = vmatmul.msk.bf16.vlgmr.msra.gmra.mxu1 %vm121_vm0, %v107_v8  ;;  %v101_v41 = vunpack.c.l.b16 %v67_v39  ;;  %v102_v42 = vunpack.c.l.b16 %v68_v40  ;;  %v70_v47 = vpack.c.bf16 %v54_v45, %v54_v45  ;;  %v71_v53 = vpack.c.bf16 %v55_v51, %v55_v51  ;;  %v860_v8 = vld [vmem:[%s930_s3] sm:$0xf]  ;;  %s792_s3 = smov [#allocation5]  }
  0x11   :  { %v111_v36 = vpack.c.b16 %v100_v35, %v99_v34  ;;  %v103_v48 = vunpack.c.l.b16 %v69_v46  ;;  %v72_v54 = vpack.c.bf16 %v56_v52, %v56_v52  ;;  %s631_s4 = sshll.u32 %s792_s3, 4  ;;  %s632_s4 = int_to_ptr.vmem [resolvable:$true] %s631_s4 }
  0x12   :  { %v112_v43 = vpack.c.b16 %v102_v42, %v101_v41  ;;  %v104_v49 = vunpack.c.l.b16 %v70_v47  ;;  %v105_v55 = vunpack.c.l.b16 %v71_v53 }
  0x13   :  { %v106_v56 = vunpack.c.l.b16 %v72_v54 }
  0x14   :  { %v113_v50 = vpack.c.b16 %v104_v49, %v103_v48 }
  0x15   :  { %v114_v57 = vpack.c.b16 %v106_v56, %v105_v55 }
  0x20   :  { %669 = vmatmul.msk.bf16.gmra.mxu0 %vm121_vm0, %v108_v15  ;;  %681 = vmatmul.msk.bf16.gmra.mxu1 %vm121_vm0, %v108_v15 }
  0x30   :  { %670 = vmatmul.msk.bf16.gmra.mxu0 %vm121_vm0, %v109_v22  ;;  %682 = vmatmul.msk.bf16.gmra.mxu1 %vm121_vm0, %v109_v22 }
  0x40   :  { %671 = vmatmul.msk.bf16.gmra.mxu0 %vm121_vm0, %v110_v29  ;;  %683 = vmatmul.msk.bf16.gmra.mxu1 %vm121_vm0, %v110_v29 }
  0x50   :  { %672 = vmatmul.msk.bf16.gmra.mxu0 %vm121_vm0, %v111_v36  ;;  %684 = vmatmul.msk.bf16.gmra.mxu1 %vm121_vm0, %v111_v36 }
  0x60   :  { %673 = vmatmul.msk.bf16.gmra.mxu0 %vm121_vm0, %v112_v43  ;;  %685 = vmatmul.msk.bf16.gmra.mxu1 %vm121_vm0, %v112_v43 }
  0x70   :  { %674 = vmatmul.msk.bf16.gmra.mxu0 %vm121_vm0, %v113_v50  ;;  %686 = vmatmul.msk.bf16.gmra.mxu1 %vm121_vm0, %v113_v50 }
  0x80   :  { %675 = vmatmul.msk.bf16.gmra.mxu0 %vm121_vm0, %v114_v57  ;;  %687 = vmatmul.msk.bf16.gmra.mxu1 %vm121_vm0, %v114_v57 }
  0x8d   :  { %v155_v58 = vpop.f32.mrf.mxu0  ;;  %v228_v59 = vpop.f32.mrf.mxu1 }
  0x8e   :  { %v195_v60 = vpack.c.bf16 %v155_v58, %v155_v58  ;;  %v268_v61 = vpack.c.bf16 %v228_v59, %v228_v59 }
  0x90   :  { %v288_v2 = vunpack.c.l.b16 %v195_v60  ;;  %v310_v3 = vunpack.c.l.b16 %v268_v61 }
  0x95   :  { %v157_v62 = vpop.f32.mrf.mxu0  ;;  %v230_v63 = vpop.f32.mrf.mxu1 }
  0x96   :  { %v196_v0 = vpack.c.bf16 %v157_v62, %v157_v62  ;;  %v269_v1 = vpack.c.bf16 %v230_v63, %v230_v63 }
  0x98   :  { %v289_v4 = vunpack.c.l.b16 %v196_v0  ;;  %v311_v5 = vunpack.c.l.b16 %v269_v1 }
  0x9a   :  { %v290_v6 = vpack.c.b16 %v289_v4, %v288_v2  ;;  %v312_v7 = vpack.c.b16 %v311_v5, %v310_v3 }
  0x9c   :  { %302 = vmatpush.bf16.msra.mxu2 %v290_v6  ;;  %324 = vmatpush.bf16.msra.mxu3 %v312_v7 }
  0x9d   :  { %v160_v10 = vpop.f32.mrf.mxu0  ;;  %v233_v11 = vpop.f32.mrf.mxu1 }
  0x9e   :  { %v197_v12 = vpack.c.bf16 %v160_v10, %v160_v10  ;;  %v270_v13 = vpack.c.bf16 %v233_v11, %v233_v11 }
  0x9f   :  { %688 = vmatmul.msk.bf16.vlgmr.msra.gmra.mxu2 %vm121_vm0, %v860_v8  ;;  %689 = vmatmul.msk.bf16.vlgmr.msra.gmra.mxu3 %vm121_vm0, %v865_v9 }
  0xa0   :  { %v335_v18 = vunpack.c.l.b16 %v197_v12  ;;  %v354_v19 = vunpack.c.l.b16 %v270_v13 }
  0xa5   :  { %v162_v14 = vpop.f32.mrf.mxu0  ;;  %v235_v15 = vpop.f32.mrf.mxu1 }
  0xa6   :  { %v198_v16 = vpack.c.bf16 %v162_v14, %v162_v14  ;;  %v271_v17 = vpack.c.bf16 %v235_v15, %v235_v15 }
  0xa8   :  { %v336_v20 = vunpack.c.l.b16 %v198_v16  ;;  %v355_v21 = vunpack.c.l.b16 %v271_v17 }
  0xaa   :  { %v337_v22 = vpack.c.b16 %v336_v20, %v335_v18  ;;  %v356_v23 = vpack.c.b16 %v355_v21, %v354_v19 }
  0xac   :  { %346 = vmatpush.bf16.msrb.mxu2 %v337_v22  ;;  %365 = vmatpush.bf16.msrb.mxu3 %v356_v23 }
  0xad   :  { %v165_v24 = vpop.f32.mrf.mxu0  ;;  %v238_v25 = vpop.f32.mrf.mxu1 }
  0xae   :  { %v199_v26 = vpack.c.bf16 %v165_v24, %v165_v24  ;;  %v272_v27 = vpack.c.bf16 %v238_v25, %v238_v25 }
  0xaf   :  { %690 = vmatmul.msk.bf16.vlgmr.msrb.gmra.mxu2 %vm121_vm0, %v860_v8  ;;  %691 = vmatmul.msk.bf16.vlgmr.msrb.gmra.mxu3 %vm121_vm0, %v865_v9 }
  0xb0   :  { %v377_v32 = vunpack.c.l.b16 %v199_v26  ;;  %v396_v33 = vunpack.c.l.b16 %v272_v27 }
  0xb5   :  { %v167_v28 = vpop.f32.mrf.mxu0  ;;  %v240_v29 = vpop.f32.mrf.mxu1 }
  0xb6   :  { %v200_v30 = vpack.c.bf16 %v167_v28, %v167_v28  ;;  %v273_v31 = vpack.c.bf16 %v240_v29, %v240_v29 }
  0xb8   :  { %v378_v34 = vunpack.c.l.b16 %v200_v30  ;;  %v397_v35 = vunpack.c.l.b16 %v273_v31 }
  0xba   :  { %v379_v36 = vpack.c.b16 %v378_v34, %v377_v32  ;;  %v398_v37 = vpack.c.b16 %v397_v35, %v396_v33 }
  0xbc   :  { %388 = vmatpush.bf16.msra.mxu2 %v379_v36  ;;  %407 = vmatpush.bf16.msra.mxu3 %v398_v37 }
  0xbd   :  { %v170_v38 = vpop.f32.mrf.mxu0  ;;  %v243_v39 = vpop.f32.mrf.mxu1 }
  0xbe   :  { %v201_v40 = vpack.c.bf16 %v170_v38, %v170_v38  ;;  %v274_v41 = vpack.c.bf16 %v243_v39, %v243_v39 }
  0xbf   :  { %692 = vmatmul.msk.bf16.vlgmr.msra.gmra.mxu2 %vm121_vm0, %v860_v8  ;;  %693 = vmatmul.msk.bf16.vlgmr.msra.gmra.mxu3 %vm121_vm0, %v865_v9 }
  0xc0   :  { %v419_v46 = vunpack.c.l.b16 %v201_v40  ;;  %v438_v47 = vunpack.c.l.b16 %v274_v41 }
  0xc5   :  { %v172_v42 = vpop.f32.mrf.mxu0  ;;  %v245_v43 = vpop.f32.mrf.mxu1 }
  0xc6   :  { %v202_v44 = vpack.c.bf16 %v172_v42, %v172_v42  ;;  %v275_v45 = vpack.c.bf16 %v245_v43, %v245_v43 }
  0xc8   :  { %v420_v48 = vunpack.c.l.b16 %v202_v44  ;;  %v439_v49 = vunpack.c.l.b16 %v275_v45 }
  0xca   :  { %v421_v50 = vpack.c.b16 %v420_v48, %v419_v46  ;;  %v440_v51 = vpack.c.b16 %v439_v49, %v438_v47 }
  0xcc   :  { %430 = vmatpush.bf16.msrb.mxu2 %v421_v50  ;;  %449 = vmatpush.bf16.msrb.mxu3 %v440_v51 }
  0xcd   :  { %v175_v52 = vpop.f32.mrf.mxu0  ;;  %v248_v53 = vpop.f32.mrf.mxu1 }
  0xce   :  { %v203_v54 = vpack.c.bf16 %v175_v52, %v175_v52  ;;  %v276_v55 = vpack.c.bf16 %v248_v53, %v248_v53 }
  0xcf   :  { %694 = vmatmul.msk.bf16.vlgmr.msrb.gmra.mxu2 %vm121_vm0, %v860_v8  ;;  %695 = vmatmul.msk.bf16.vlgmr.msrb.gmra.mxu3 %vm121_vm0, %v865_v9 }
  0xd0   :  { %v461_v60 = vunpack.c.l.b16 %v203_v54  ;;  %v480_v61 = vunpack.c.l.b16 %v276_v55 }
  0xd5   :  { %v177_v56 = vpop.f32.mrf.mxu0  ;;  %v250_v57 = vpop.f32.mrf.mxu1 }
  0xd6   :  { %v204_v58 = vpack.c.bf16 %v177_v56, %v177_v56  ;;  %v277_v59 = vpack.c.bf16 %v250_v57, %v250_v57 }
  0xd8   :  { %v462_v62 = vunpack.c.l.b16 %v204_v58  ;;  %v481_v63 = vunpack.c.l.b16 %v277_v59 }
  0xda   :  { %v463_v0 = vpack.c.b16 %v462_v62, %v461_v60  ;;  %v482_v1 = vpack.c.b16 %v481_v63, %v480_v61 }
  0xdc   :  { %472 = vmatpush.bf16.msra.mxu2 %v463_v0  ;;  %491 = vmatpush.bf16.msra.mxu3 %v482_v1 }
  0xdd   :  { %v180_v2 = vpop.f32.mrf.mxu0  ;;  %v253_v3 = vpop.f32.mrf.mxu1 }
  0xde   :  { %v205_v4 = vpack.c.bf16 %v180_v2, %v180_v2  ;;  %v278_v5 = vpack.c.bf16 %v253_v3, %v253_v3 }
  0xdf   :  { %696 = vmatmul.msk.bf16.vlgmr.msra.gmra.mxu2 %vm121_vm0, %v860_v8  ;;  %697 = vmatmul.msk.bf16.vlgmr.msra.gmra.mxu3 %vm121_vm0, %v865_v9 }
  0xe0   :  { %v503_v12 = vunpack.c.l.b16 %v205_v4  ;;  %v522_v13 = vunpack.c.l.b16 %v278_v5 }
  0xe5   :  { %v182_v6 = vpop.f32.mrf.mxu0  ;;  %v255_v7 = vpop.f32.mrf.mxu1 }
  0xe6   :  { %v206_v10 = vpack.c.bf16 %v182_v6, %v182_v6  ;;  %v279_v11 = vpack.c.bf16 %v255_v7, %v255_v7 }
  0xe8   :  { %v504_v14 = vunpack.c.l.b16 %v206_v10  ;;  %v523_v15 = vunpack.c.l.b16 %v279_v11 }
  0xea   :  { %v505_v16 = vpack.c.b16 %v504_v14, %v503_v12  ;;  %v524_v17 = vpack.c.b16 %v523_v15, %v522_v13 }
  0xec   :  { %514 = vmatpush.bf16.msrb.mxu2 %v505_v16  ;;  %533 = vmatpush.bf16.msrb.mxu3 %v524_v17 }
  0xed   :  { %v185_v18 = vpop.f32.mrf.mxu0  ;;  %v258_v19 = vpop.f32.mrf.mxu1 }
  0xee   :  { %v207_v20 = vpack.c.bf16 %v185_v18, %v185_v18  ;;  %v280_v21 = vpack.c.bf16 %v258_v19, %v258_v19 }
  0xef   :  { %698 = vmatmul.msk.bf16.vlgmr.msrb.gmra.mxu2 %vm121_vm0, %v860_v8  ;;  %699 = vmatmul.msk.bf16.vlgmr.msrb.gmra.mxu3 %vm121_vm0, %v865_v9 }
  0xf0   :  { %v545_v26 = vunpack.c.l.b16 %v207_v20  ;;  %v564_v27 = vunpack.c.l.b16 %v280_v21 }
  0xf5   :  { %v187_v22 = vpop.f32.mrf.mxu0  ;;  %v260_v23 = vpop.f32.mrf.mxu1 }
  0xf6   :  { %v208_v24 = vpack.c.bf16 %v187_v22, %v187_v22  ;;  %v281_v25 = vpack.c.bf16 %v260_v23, %v260_v23 }
  0xf8   :  { %v546_v28 = vunpack.c.l.b16 %v208_v24  ;;  %v565_v29 = vunpack.c.l.b16 %v281_v25 }
  0xfa   :  { %v547_v30 = vpack.c.b16 %v546_v28, %v545_v26  ;;  %v566_v31 = vpack.c.b16 %v565_v29, %v564_v27 }
  0xfc   :  { %556 = vmatpush.bf16.msra.mxu2 %v547_v30  ;;  %575 = vmatpush.bf16.msra.mxu3 %v566_v31 }
  0xfd   :  { %v190_v32 = vpop.f32.mrf.mxu0  ;;  %v263_v33 = vpop.f32.mrf.mxu1 }
  0xfe   :  { %v209_v34 = vpack.c.bf16 %v190_v32, %v190_v32  ;;  %v282_v35 = vpack.c.bf16 %v263_v33, %v263_v33 }
  0xff   :  { %700 = vmatmul.msk.bf16.vlgmr.msra.gmra.mxu2 %vm121_vm0, %v860_v8  ;;  %701 = vmatmul.msk.bf16.vlgmr.msra.gmra.mxu3 %vm121_vm0, %v865_v9 }
 0x100   :  { %v587_v40 = vunpack.c.l.b16 %v209_v34  ;;  %v606_v41 = vunpack.c.l.b16 %v282_v35 }
 0x105   :  { %v192_v36 = vpop.f32.mrf.mxu0  ;;  %v265_v37 = vpop.f32.mrf.mxu1 }
 0x106   :  { %v210_v38 = vpack.c.bf16 %v192_v36, %v192_v36  ;;  %v283_v39 = vpack.c.bf16 %v265_v37, %v265_v37 }
 0x108   :  { %v588_v42 = vunpack.c.l.b16 %v210_v38  ;;  %v607_v43 = vunpack.c.l.b16 %v283_v39 }
 0x10a   :  { %v589_v44 = vpack.c.b16 %v588_v42, %v587_v40  ;;  %v608_v45 = vpack.c.b16 %v607_v43, %v606_v41 }
 0x10c   :  { %598 = vmatpush.bf16.msrb.mxu2 %v589_v44  ;;  %617 = vmatpush.bf16.msrb.mxu3 %v608_v45 }
 0x10f   :  { %702 = vmatmul.msk.bf16.vlgmr.msrb.gmra.mxu2 %vm121_vm0, %v860_v8  ;;  %703 = vmatmul.msk.bf16.vlgmr.msrb.gmra.mxu3 %vm121_vm0, %v865_v9 }
 0x122   :  { %v304_v46 = vpop.f32.mrf.mxu2  ;;  %v326_v47 = vpop.f32.mrf.mxu3 }
 0x123   :  { %331 = vst.msk [vmem:[#allocation5] sm:$0xff] %vm330_vm1, %v304_v46 }
 0x124   :  { %332 = vst.msk [vmem:[#allocation6] sm:$0xff] %vm330_vm1, %v326_v47 }
 0x12a   :  { %v306_v48 = vpop.f32.mrf.mxu2  ;;  %v328_v49 = vpop.f32.mrf.mxu3 }
 0x132   :  { %v348_v50 = vpop.f32.mrf.mxu2  ;;  %v367_v51 = vpop.f32.mrf.mxu3 }
 0x133   :  { %372 = vst.msk [vmem:[#allocation5 + $0x8] sm:$0xff] %vm330_vm1, %v348_v50 }
 0x134   :  { %374 = vst.msk [vmem:[#allocation6 + $0x8] sm:$0xff] %vm330_vm1, %v367_v51 }
 0x13a   :  { %v350_v52 = vpop.f32.mrf.mxu2  ;;  %v369_v8 = vpop.f32.mrf.mxu3 }
 0x142   :  { %v390_v53 = vpop.f32.mrf.mxu2  ;;  %v409_v54 = vpop.f32.mrf.mxu3 }
 0x143   :  { %414 = vst.msk [vmem:[#allocation5 + $0x10] sm:$0xff] %vm330_vm1, %v390_v53 }
 0x144   :  { %416 = vst.msk [vmem:[#allocation6 + $0x10] sm:$0xff] %vm330_vm1, %v409_v54 }
 0x14a   :  { %v392_v9 = vpop.f32.mrf.mxu2  ;;  %v411_v55 = vpop.f32.mrf.mxu3 }
 0x152   :  { %v432_v56 = vpop.f32.mrf.mxu2  ;;  %v451_v57 = vpop.f32.mrf.mxu3 }
 0x153   :  { %456 = vst.msk [vmem:[#allocation5 + $0x18] sm:$0xff] %vm330_vm1, %v432_v56 }
 0x154   :  { %458 = vst.msk [vmem:[#allocation6 + $0x18] sm:$0xff] %vm330_vm1, %v451_v57 }
 0x15a   :  { %v434_v58 = vpop.f32.mrf.mxu2  ;;  %v453_v59 = vpop.f32.mrf.mxu3 }
 0x162   :  { %v474_v60 = vpop.f32.mrf.mxu2  ;;  %v493_v61 = vpop.f32.mrf.mxu3 }
 0x163   :  { %498 = vst.msk [vmem:[#allocation5 + $0x20] sm:$0xff] %vm330_vm1, %v474_v60 }
 0x164   :  { %500 = vst.msk [vmem:[#allocation6 + $0x20] sm:$0xff] %vm330_vm1, %v493_v61 }
 0x16a   :  { %v476_v62 = vpop.f32.mrf.mxu2  ;;  %v495_v63 = vpop.f32.mrf.mxu3 }
 0x172   :  { %v516_v0 = vpop.f32.mrf.mxu2  ;;  %v535_v1 = vpop.f32.mrf.mxu3 }
 0x173   :  { %540 = vst.msk [vmem:[#allocation5 + $0x28] sm:$0xff] %vm330_vm1, %v516_v0 }
 0x174   :  { %542 = vst.msk [vmem:[#allocation6 + $0x28] sm:$0xff] %vm330_vm1, %v535_v1 }
 0x17a   :  { %v518_v2 = vpop.f32.mrf.mxu2  ;;  %v537_v3 = vpop.f32.mrf.mxu3 }
 0x182   :  { %v558_v4 = vpop.f32.mrf.mxu2  ;;  %v577_v5 = vpop.f32.mrf.mxu3 }
 0x183   :  { %582 = vst.msk [vmem:[#allocation5 + $0x30] sm:$0xff] %vm330_vm1, %v558_v4 }
 0x184   :  { %584 = vst.msk [vmem:[#allocation6 + $0x30] sm:$0xff] %vm330_vm1, %v577_v5 }
 0x18a   :  { %v560_v6 = vpop.f32.mrf.mxu2  ;;  %v579_v7 = vpop.f32.mrf.mxu3 }
 0x192   :  { %v600_v10 = vpop.f32.mrf.mxu2  ;;  %v619_v11 = vpop.f32.mrf.mxu3 }
 0x193   :  { %624 = vst.msk [vmem:[#allocation5 + $0x38] sm:$0xff] %vm330_vm1, %v600_v10 }
 0x194   :  { %626 = vst.msk [vmem:[#allocation6 + $0x38] sm:$0xff] %vm330_vm1, %v619_v11  ;;  %639 = dma.vmem_to_hbm [thread:$0]  %s632_s4, 1024, %s634_s11, [#allocation4], %s790_s26, %s790_s26, %s791_s27  }
 0x195   :  { %652 = dma.vmem_to_hbm [thread:$0]  %s645_s13, 1024, %s647_s16, [#allocation7], %s790_s26, %s790_s26, %s791_s27  }
 0x19a   :  { %v602_v12 = vpop.f32.mrf.mxu2  ;;  %v621_v13 = vpop.f32.mrf.mxu3 }
 0x19b   :  { %785 = dma.done.wait [#allocation4], 1024  }
 0x19c   :  { %786 = vsyncadd [#allocation4], 4294966272 }
 0x19d   :  { %787 = dma.done.wait [#allocation7], 1024  }
 0x19e   :  { %788 = vsyncadd [#allocation7], 4294966272 }
 0x19f   :  { %661 = vsyncpa [#allocation3], 1 }
 0x1a0   :  { %662 = vsyncpa [#allocation4], 1 }
 0x1a1   :  { %663 = vsyncpa [#allocation7], 1 }

</bundles_post_ra>
